<compile_context>
chip_gen: v7x
topology: tpu7x:2x2x1
jax: 0.10.0
libtpu: 0.0.40
codegen_flags: <defaults>
</compile_context>

<pallas_src>
import functools

import jax
import jax.numpy as jnp
from jax.experimental import pallas as pl
from jax.experimental.pallas import tpu as pltpu


def _round_up(x, m):
    return ((x + m - 1) // m) * m


def _instance_norm_kernel(x_ref, scale_ref, shift_ref, o_ref, *, inv_count, eps):
    # x_ref block: (1, TC, HW_pad); scale_ref/shift_ref blocks: (TC, 1)
    x = x_ref[0].astype(jnp.float32)                      # (TC, HW_pad)
    # Single pass over the strip: sum and sum-of-squares (padded lanes are zero).
    s1 = jnp.sum(x, axis=-1, keepdims=True)               # (TC, 1)
    s2 = jnp.sum(x * x, axis=-1, keepdims=True)           # (TC, 1)
    mean = s1 * inv_count
    # Biased variance, matching the PyTorch forward (std(unbiased)^2 * (n-1)/n).
    # Clamp >= 0 to guard against cancellation in E[x^2] - mean^2.
    var = jnp.maximum(s2 * inv_count - mean * mean, 0.0)
    # Fuse the affine scale into the per-channel normalization scalar: one (TC,1)
    # multiply instead of an extra full-width (TC, HW_pad) multiply.
    a = jax.lax.rsqrt(var + eps) * scale_ref[...].astype(jnp.float32)   # (TC, 1)
    b = shift_ref[...].astype(jnp.float32)                              # (TC, 1)
    o_ref[0] = ((x - mean) * a + b).astype(o_ref.dtype)


def instance_normalization(x, scale, shift, eps=1e-9):
    """x: (N, C, H, W); scale, shift: (C,). Returns same shape/dtype as x."""
    N, C, H, W = x.shape
    HW = H * W

    # Lane-dense last dim (multiple of 128) and sublane-aligned channel tile.
    HW_pad = _round_up(HW, 128)
    C8 = _round_up(C, 8)

    # Per-step VMEM footprint ~= 4 big buffers (input + output, each double
    # buffered) of TC * HW_pad f32. Cap the total at ~16 MiB: large enough to be
    # well onto the HBM-bandwidth roofline, small enough to fit comfortably on
    # every chip (v5e/v6e/v7x) with headroom for compiler scratch.
    vmem_block_budget = 16 * 1024 * 1024
    max_tc = max(8, (vmem_block_budget // (4 * 4 * HW_pad)) // 8 * 8)
    TC = min(C8, max_tc)
    C_pad = _round_up(C, TC)   # TC divides C_pad; both are multiples of 8

    x3 = x.reshape(N, C, HW)
    if C_pad != C or HW_pad != HW:
        x3 = jnp.pad(x3, ((0, 0), (0, C_pad - C), (0, HW_pad - HW)))
    scale2 = jnp.pad(scale.astype(jnp.float32), (0, C_pad - C)).reshape(C_pad, 1)
    shift2 = jnp.pad(shift.astype(jnp.float32), (0, C_pad - C)).reshape(C_pad, 1)

    kernel = functools.partial(_instance_norm_kernel,
                               inv_count=1.0 / HW, eps=float(eps))

    # TODO(synk): for extremely large H*W (strip not VMEM-resident even at TC=8)
    # add an "arbitrary" HW grid axis with sum/sumsq scratch accumulators; not
    # needed at these sizes.
    out3 = pl.pallas_call(
        kernel,
        out_shape=jax.ShapeDtypeStruct((N, C_pad, HW_pad), x.dtype),
        grid_spec=pltpu.PrefetchScalarGridSpec(
            num_scalar_prefetch=0,
            grid=(N, C_pad // TC),
            in_specs=[
                pl.BlockSpec((1, TC, HW_pad), lambda n, c: (n, c, 0)),
                pl.BlockSpec((TC, 1), lambda n, c: (c, 0)),
                pl.BlockSpec((TC, 1), lambda n, c: (c, 0)),
            ],
            out_specs=pl.BlockSpec((1, TC, HW_pad), lambda n, c: (n, c, 0)),
        ),
        compiler_params=pltpu.CompilerParams(
            # Sample and channel axes are fully independent.
            dimension_semantics=("parallel", "parallel"),
            vmem_limit_bytes=48 * 1024 * 1024,
        ),
    )(x3, scale2, shift2)

    if C_pad != C or HW_pad != HW:
        out3 = out3[:, :C, :HW]
    return out3.reshape(N, C, H, W)


if __name__ == "__main__":
    key = jax.random.PRNGKey(0)
    kx, kscale = jax.random.split(key)

    N, C, H, W = 2, 4, 16, 16
    x = jax.random.normal(kx, (N, C, H, W), dtype=jnp.float32)

    # Deterministic parameter init matching the module's _reset_parameters:
    # scale ~ uniform[0, 1), shift = 0
    scale = jax.random.uniform(kscale, (C,), dtype=jnp.float32)
    shift = jnp.zeros((C,), dtype=jnp.float32)

    out = instance_normalization(x, scale, shift, eps=1e-9)
    out = jax.block_until_ready(out)

    # Sanity check against a pure-JAX reference of the module's forward.
    x3 = x.reshape(N, C, H * W)
    mean = jnp.mean(x3, axis=2, keepdims=True)
    var = jnp.mean((x3 - mean) ** 2, axis=2, keepdims=True)
    ref = (x3 - mean) / jnp.sqrt(var + 1e-9)
    ref = ref.reshape(N, C, H, W) * scale[None, :, None, None] + shift[None, :, None, None]
    assert jnp.allclose(out, ref, atol=1e-5, rtol=1e-5)

    print("KERNEL_OK")
</pallas_src>

<mosaic_0001>
module attributes {stable_mosaic.version = 11 : i64} {
  func.func @_instance_norm_kernel(%arg0: i32, %arg1: i32, %arg2: memref<1x8x256xf32, #tpu.memory_space<vmem>>, %arg3: memref<8x1xf32, #tpu.memory_space<vmem>>, %arg4: memref<8x1xf32, #tpu.memory_space<vmem>>, %arg5: memref<1x8x256xf32, #tpu.memory_space<vmem>>) attributes {dimension_semantics = [#tpu.dimension_semantics<parallel>, #tpu.dimension_semantics<parallel>], iteration_bounds = array<i64: 2, 1>, scalar_prefetch = 0 : i64, scratch_operands = 0 : i64, tpu.core_type = #tpu.core_type<tc>, window_params = [{transform_indices = @transform_0, window_bounds = array<i64: 1, 8, 256>}, {transform_indices = @transform_1, window_bounds = array<i64: 8, 1>}, {transform_indices = @transform_2, window_bounds = array<i64: 8, 1>}, {transform_indices = @transform_3, window_bounds = array<i64: 1, 8, 256>}]} {
    %c0 = arith.constant 0 : index
    %c0_0 = arith.constant 0 : index
    %c0_1 = arith.constant 0 : index
    %0 = vector.load %arg2[%c0, %c0_0, %c0_1] : memref<1x8x256xf32, #tpu.memory_space<vmem>>, vector<1x8x256xf32>
    %1 = vector.shape_cast %0 : vector<1x8x256xf32> to vector<8x256xf32>
    %cst = arith.constant dense<0.000000e+00> : vector<8xf32>
    %2 = vector.multi_reduction <add>, %1, %cst [1] : vector<8x256xf32> to vector<8xf32>
    %3 = vector.shape_cast %2 : vector<8xf32> to vector<8x1xf32>
    %4 = arith.mulf %1, %1 : vector<8x256xf32>
    %cst_2 = arith.constant dense<0.000000e+00> : vector<8xf32>
    %5 = vector.multi_reduction <add>, %4, %cst_2 [1] : vector<8x256xf32> to vector<8xf32>
    %6 = vector.shape_cast %5 : vector<8xf32> to vector<8x1xf32>
    %cst_3 = arith.constant 3.906250e-03 : f32
    %7 = vector.broadcast %cst_3 : f32 to vector<8x1xf32>
    %8 = arith.mulf %3, %7 : vector<8x1xf32>
    %cst_4 = arith.constant 3.906250e-03 : f32
    %9 = vector.broadcast %cst_4 : f32 to vector<8x1xf32>
    %10 = arith.mulf %6, %9 : vector<8x1xf32>
    %11 = arith.mulf %8, %8 : vector<8x1xf32>
    %12 = arith.subf %10, %11 : vector<8x1xf32>
    %cst_5 = arith.constant 0.000000e+00 : f32
    %13 = vector.broadcast %cst_5 : f32 to vector<8x1xf32>
    %14 = arith.maximumf %12, %13 : vector<8x1xf32>
    %cst_6 = arith.constant 9.99999971E-10 : f32
    %15 = vector.broadcast %cst_6 : f32 to vector<8x1xf32>
    %16 = arith.addf %14, %15 : vector<8x1xf32>
    %17 = math.rsqrt %16 : vector<8x1xf32>
    %c0_7 = arith.constant 0 : index
    %c0_8 = arith.constant 0 : index
    %18 = vector.load %arg3[%c0_7, %c0_8] : memref<8x1xf32, #tpu.memory_space<vmem>>, vector<8x1xf32>
    %19 = arith.mulf %17, %18 : vector<8x1xf32>
    %c0_9 = arith.constant 0 : index
    %c0_10 = arith.constant 0 : index
    %20 = vector.load %arg4[%c0_9, %c0_10] : memref<8x1xf32, #tpu.memory_space<vmem>>, vector<8x1xf32>
    %21 = vector.broadcast %8 : vector<8x1xf32> to vector<8x256xf32>
    %22 = arith.subf %1, %21 : vector<8x256xf32>
    %23 = vector.broadcast %19 : vector<8x1xf32> to vector<8x256xf32>
    %24 = arith.mulf %22, %23 : vector<8x256xf32>
    %25 = vector.broadcast %20 : vector<8x1xf32> to vector<8x256xf32>
    %26 = arith.addf %24, %25 : vector<8x256xf32>
    %c0_11 = arith.constant 0 : index
    %c0_12 = arith.constant 0 : index
    %c0_13 = arith.constant 0 : index
    %27 = vector.load %arg5[%c0_11, %c0_12, %c0_13] : memref<1x8x256xf32, #tpu.memory_space<vmem>>, vector<1x8x256xf32>
    %28 = vector.shape_cast %27 : vector<1x8x256xf32> to vector<8x256xf32>
    %29 = vector.shape_cast %26 : vector<8x256xf32> to vector<1x8x256xf32>
    tpu.vector_store %arg5[%c0_11, %c0_12, %c0_13], %29 {strides = array<i32>} : memref<1x8x256xf32, #tpu.memory_space<vmem>>, vector<1x8x256xf32>,
    return
  }
  func.func @transform_0(%arg0: i32, %arg1: i32) -> (i32, i32, i32) {
    %c0_i32 = arith.constant 0 : i32
    %c0_i32_0 = arith.constant 0 : i32
    return %arg0, %arg1, %c0_i32 : i32, i32, i32
  }
  func.func @transform_1(%arg0: i32, %arg1: i32) -> (i32, i32) {
    %c0_i32 = arith.constant 0 : i32
    %c0_i32_0 = arith.constant 0 : i32
    return %arg1, %c0_i32 : i32, i32
  }
  func.func @transform_2(%arg0: i32, %arg1: i32) -> (i32, i32) {
    %c0_i32 = arith.constant 0 : i32
    %c0_i32_0 = arith.constant 0 : i32
    return %arg1, %c0_i32 : i32, i32
  }
  func.func @transform_3(%arg0: i32, %arg1: i32) -> (i32, i32, i32) {
    %c0_i32 = arith.constant 0 : i32
    %c0_i32_0 = arith.constant 0 : i32
    return %arg0, %arg1, %c0_i32 : i32, i32, i32
  }
}

</mosaic_0001>

<bundles_post_ra>
// kernel: tpu_custom_call.1
= control target key start
LH: loop header
LB: loop body
LE: loop exit
PB: predicated region body
PF: predicated region fallthrough
CT: control target
= control target key end

     0   :  { %8 = vsyncpa [#allocation3], 0  ;;  %s813_s0 = inlined_call_operand.hbm [shape: f32[2,8,256], index: 0, kind: input, shape index: {}]   ;;  %s814_s1 = inlined_call_operand.vmem [shape: f32[8,1], index: 1, kind: input, shape index: {}]   ;;  %s815_s2 = inlined_call_operand.vmem [shape: f32[8,1], index: 2, kind: input, shape index: {}]   ;;  %s816_s3 = inlined_call_operand.hbm [shape: f32[2,8,256], index: 3, kind: output, shape index: {}]  }
   0x1   :  { %10 = vsyncpa [#allocation3 + $0x1], 0 }
   0x2   :  { %11 = vsyncpa [#allocation4], 0 }
   0x3   :  { %13 = vsyncpa [#allocation4 + $0x1], 0  ;;  %s631_s12 = smov 0   ;;  %s633_s13 = smov 0  }
   0x4   :  { %s635_s14 = smov 0   ;;  %s637_s15 = smov 0  }
   0x5   :  { %s639_s16 = smov 0   ;;  %s641_s17 = smov 0  }
   0x6 LB: > { %s408_s18 = sadd.s32 4294967295, %s606_s17   ;;  %s409_s19 = sadd.s32 4294967294, %s606_s17   ;;  %s606_s17 = sphi %s641_s17, %s19_s17   ;;  %s602_s16 = sphi %s639_s16, %s832_s16   ;;  %s598_s15 = sphi %s637_s15, %s831_s15   ;;  %s594_s14 = sphi %s635_s14, %s830_s14   ;;  %s590_s13 = sphi %s633_s13, %s829_s13   ;;  %s586_s12 = sphi %s631_s12, %s828_s12  }
   0x7   : > { %s31_s20 = sadd.s32 1, %s602_s16  ;;  %s40_s21 = sadd.s32 1, %s594_s14 }
   0x8   : > { %p33_p0 = scmp.ge.s32.totalorder %s31_s20, 2  ;;  %p47_p1 = scmp.ne.s32.totalorder %s594_s14, %s590_s13 }
   0x9   : > { %p48_p2 = scmp.eq.s32.totalorder %s606_s17, 0  ;;  %p53_p3 = scmp.ne.s32.totalorder %s590_s13, %s586_s12 }
   0xa   : > { %s834_s20 = smov (%p33_p0, %s31_s20), 0  ;;  %p54_p5 = scmp.eq.s32.totalorder %s408_s18, 0 }
   0xb   : > { %p672_p4 = por %p48_p2, %p47_p1  ;;  %s35_s23 = ssub.s32 %s602_s16, %s834_s20 }
   0xc   : > { %p131_p6 = scmp.eq.s32.totalorder %s408_s18, 1  ;;  %p38_p7 = scmp.eq.s32.totalorder %s35_s23, 0 }
   0xd   : > { %p678_p8 = por %p54_p5, %p53_p3  ;;  %p137_p10 = scmp.eq.s32.totalorder %s409_s19, 1 }
   0xe   : > { %p682_p9 = por %p131_p6, %p47_p1  ;;  %p439_p13 = scmp.lt.s32.totalorder %s606_s17, 2 }
   0xf   : > { %s687_s26 = scalar_select %p38_p7, %s594_s14, %s40_s21  }
  0x10   : > { %s820_s25 = scalar_select %p682_p9, 1, 0 }
  0x11   : > { %p689_p11 = por %p137_p10, %p53_p3  ;;  %s171_s28 = sand.u32 1, %s594_s14  }
  0x12   : > { %s414_s29 = sshll.u32 %s171_s28, 4  ;;  %s425_s30 = sshll.u32 %s602_s16, 8 }
  0x13   : > { %s821_s27 = scalar_select %p689_p11, 1, 0 }
  0x14   : > { %s700_s6 = scalar_lea.hbm %s813_s0, %s425_s30  ;;  %s175_s7 = scalar_lea.vmem [#allocation2], %s414_s29 }
  0x15   : > { %s185_s8 = sshll.u32 %s175_s7, 4  ;;  %p706_p0 = pnand %p439_p13, %p672_p4  ;;  %s702_s8 = int_to_ptr.vmem [resolvable:$true] %s185_s8 }
  0x16   : > { %s172_s10 = scalar_lea.sflag [#allocation3], %s171_s28  ;;  %s494_s11 = scalar_lea.hbm %s700_s6, 256 }
  0x17   : > { %p495_p3 = scmp.ne.s32.totalorder %s700_s6, %s494_s11  ;;  %p496_p5 = pneg %p706_p0 }
  0x18   : > { %s499_s21 = scalar_lea.hbm %s813_s0, 512  ;;  %p500_p4 = scmp.lt.u32.totalorder %s700_s6, %s813_s0 }
  0x19   : > { %p497_p6 = pnand %p496_p5, %p495_p3  ;;  %p501_p10 = scmp.lt.u32.totalorder %s499_s21, %s494_s11 }
  0x1a   : > { %p503_p12 = scmp.lt.u32.totalorder %s494_s11, %s700_s6 }
  0x1b   : > { %p498_p7 = pneg %p497_p6  ;;  %p502_p13 = por %p501_p10, %p500_p4 }
  0x1d   : > { %p504_p1 = por %p503_p12, %p502_p13 }
  0x1f   : > { %p505_p2 = pnand %p504_p1, %p498_p7 }
  0x21   : > { %508 = shalt.err (!%p505_p2)
}
  0x22   : > { %s509_s28 = scalar_lea.vmem %s702_s8, 256  ;;  %s608_s29 = smov [#allocation2]  }
  0x23   : > { %p510_p3 = scmp.ne.s32.totalorder %s702_s8, %s509_s28  ;;  %s514_s30 = sshll.u32 %s608_s29, 4  ;;  %s515_s30 = int_to_ptr.vmem [resolvable:$false] %s514_s30 }
  0x24   : > { %s516_s4 = scalar_lea.vmem %s515_s30, 512  ;;  %p517_p9 = scmp.lt.s32.totalorder %s702_s8, %s515_s30 }
  0x25   : > { %p512_p6 = pnand %p510_p3, %p496_p5  ;;  %p518_p4 = scmp.lt.s32.totalorder %s516_s4, %s509_s28 }
  0x27   : > { %p513_p11 = pneg %p512_p6  ;;  %p519_p10 = por %p518_p4, %p517_p9 }
  0x29   : > { %p520_p12 = pnand %p519_p10, %p513_p11 }
  0x2b   : > { %523 = shalt.err (!%p520_p12)
}
  0x2c   : > { %434 = dma.hbm_to_vmem [thread:$0]  (!%p706_p0), %s700_s6, 256, %s702_s8, %s172_s10  }
  0x2d   : > { %p823_p1 = scmp.lt.s32.totalorder %s606_s17, 3  ;;  %p824_p2 = scmp.ge.s32.totalorder %s606_s17, 1 }
  0x2f   : > { %p191_p5 = pnand %p824_p2, %p823_p1 }
  0x30   : > { %s742_s5 = sand.u32 (!%p191_p5), 1, %s590_s13  }
  0x31   : > { %194 = sbr.rel (%p191_p5) target bundleno = 375 (0x177), region = 32  ;;  %s418_s7 = sshll.u32 (!%p191_p5), %s742_s5, 4 }
  0x32   : > { %s197_s11 = scalar_lea.sflag (!%p191_p5), [#allocation3], %s742_s5  ;;  %s200_s9 = scalar_lea.vmem (!%p191_p5), [#allocation2], %s418_s7 }
  0x38   : > { %577 = dma.done.wait (%p678_p8), %s197_s11, 256  }
  0x39   : > { %579 = vsyncadd (%p678_p8), %s197_s11, 4294967040  ;;  %v239_v0 = vld [vmem:[%s200_s9] sm:$0xff]  ;;  %v240_v1 = vld [vmem:[%s200_s9 + $0x8] sm:$0xff]  ;;  %v609_v6 = vmov 0   ;;  %s426_s18 = sshll.u32 %s598_s15, 8  ;;  %s230_s19 = scalar_lea.vmem [#allocation5], %s418_s7 }
  0x3a   : > { %v241_v2 = vadd.f32 %v240_v1, %v239_v0  ;;  %v244_v3 = vmul.f32 %v239_v0, %v239_v0  ;;  %v245_v4 = vmul.f32 %v240_v1, %v240_v1  ;;  %490 = vset.pattern.permute.xlu1 %v609_v6  ;;  %491 = vset.pattern.permute.xlu0 %v609_v6  ;;  %v256_v15 = vld [vmem:[%s814_s1] sm:$0xff]  ;;  %s294_s21 = sshll.u32 %s230_s19, 4  ;;  %s764_s28 = scalar_lea.hbm %s816_s3, %s426_s18  ;;  %s766_s21 = int_to_ptr.vmem [resolvable:$true] %s294_s21 }
  0x3b   : > { %v258_v18 = vld [vmem:[%s815_s2] sm:$0xff]  ;;  %s278_s15 = scalar_lea.sflag [#allocation4], %s742_s5  ;;  %s524_s29 = scalar_lea.vmem %s766_s21, 256 }
  0x3c   : > { %242 = vadd.xlane.f32.xlu0 %v241_v2  ;;  %v246_v5 = vadd.f32 %v245_v4, %v244_v3  ;;  %p525_p8 = scmp.ne.s32.totalorder %s766_s21, %s524_s29  ;;  %p825_p9 = scmp.ne.s32.totalorder %s820_s25, 0 }
  0x3d   : > { %s610_s30 = smov [#allocation5]  }
  0x3e   : > { %p526_p11 = pnand %p525_p8, %p825_p9  ;;  %s528_s4 = sshll.u32 %s610_s30, 4  ;;  %s529_s4 = int_to_ptr.vmem [resolvable:$false] %s528_s4 }
  0x3f   : > { %s530_s7 = scalar_lea.vmem %s529_s4, 512  ;;  %p531_p7 = scmp.lt.s32.totalorder %s766_s21, %s529_s4 }
  0x40   : > { %247 = vadd.xlane.f32.xlu0 %v246_v5  ;;  %p527_p0 = pneg %p526_p11  ;;  %p532_p13 = scmp.lt.s32.totalorder %s530_s7, %s524_s29 }
  0x42   : > { %p533_p3 = por %p532_p13, %p531_p7 }
  0x44   : > { %p534_p6 = pnand %p533_p3, %p527_p0 }
  0xc9   : > { %v243_v7 = vpop.xlane.xlu0 %242 }
  0xca   : > { %v249_v8 = vmul.f32 0.00390625, %v243_v7 }
  0xcc   : > { %v251_v10 = vmul.f32 %v249_v8, %v249_v8  ;;  %v259_v20 = vsub.f32 %v239_v0, %v249_v8  ;;  %v260_v21 = vsub.f32 %v240_v1, %v249_v8 }
  0xcd   : > { %v248_v9 = vpop.xlane.xlu0 %247 }
  0xce   : > { %v250_v11 = vmul.f32 0.00390625, %v248_v9 }
  0xd0   : > { %v252_v12 = vsub.f32 %v250_v11, %v251_v10 }
  0xd2   : > { %v253_v13 = vmax.f32 %v252_v12, 0.0 }
  0xd4   : > { %v254_v14 = vadd.f32 1e-09, %v253_v13 }
  0xd6   : > { %492 = vrsqrt.f32 %v254_v14 }
  0xe0   : > { %v493_v16 = vpop.eup %492 }
  0xe1   : > { %v257_v17 = vmul.f32 %v493_v16, %v256_v15 }
  0xe3   : > { %263 = vperm.xlu1 %490, %v257_v17  }
  0xe7   : > { %270 = vperm.xlu1 %490, %v258_v18  }
 0x162   : > { %v264_v19 = vpop.permute.xlu1 %263 }
 0x163   : > { %v266_v22 = vmul.f32 %v264_v19, %v259_v20  ;;  %v267_v23 = vmul.f32 %v264_v19, %v260_v21 }
 0x166   : > { %v271_v24 = vpop.permute.xlu1 %270 }
 0x167   : > { %v273_v25 = vadd.f32 %v271_v24, %v266_v22  ;;  %v274_v26 = vadd.f32 %v271_v24, %v267_v23 }
 0x169   : > { %275 = vst [vmem:[%s230_s19] sm:$0xff] %v273_v25  ;;  %276 = vst [vmem:[%s230_s19 + $0x8] sm:$0xff] %v274_v26 }
 0x16a   : > { %537 = shalt.err (!%p534_p6)
}
 0x16b   : > { %s538_s5 = scalar_lea.hbm %s764_s28, 256  ;;  %s542_s24 = scalar_lea.hbm %s816_s3, 512 }
 0x16c   : > { %p539_p4 = scmp.ne.s32.totalorder %s764_s28, %s538_s5  ;;  %p543_p1 = scmp.lt.u32.totalorder %s764_s28, %s816_s3 }
 0x16d   : > { %p544_p2 = scmp.lt.u32.totalorder %s542_s24, %s538_s5  ;;  %p546_p8 = scmp.lt.u32.totalorder %s538_s5, %s764_s28 }
 0x16e   : > { %p540_p10 = pnand %p539_p4, %p825_p9 }
 0x16f   : > { %p545_p5 = por %p544_p2, %p543_p1 }
 0x170   : > { %p541_p12 = pneg %p540_p10 }
 0x171   : > { %p547_p11 = por %p546_p8, %p545_p5 }
 0x173   : > { %p548_p0 = pnand %p547_p11, %p541_p12 }
 0x175   : > { %551 = shalt.err (!%p548_p0)
}
 0x176   : > { %429 = dma.vmem_to_hbm [thread:$0]  (%p825_p9), %s766_s21, 256, %s764_s28, %s278_s15  }
 0x177 PF: > { %s306_s10 = sand.u32 1, %s586_s12   ;;  %p826_p7 = scmp.ne.s32.totalorder %s821_s27, 0 }
 0x178   : > { %p827_p13 = scmp.ge.s32.totalorder %s606_s17, 2  ;;  %s307_s18 = scalar_lea.sflag [#allocation4], %s306_s10 }
 0x17a   : > { %p436_p3 = pnand %p827_p13, %p826_p7 }
 0x17c   : > { %581 = dma.done.wait (!%p436_p3), %s307_s18, 256  }
 0x17d   : > { %583 = vsyncadd (!%p436_p3), %s307_s18, 4294967040  ;;  %s19_s17 = sadd.s32 1, %s606_s17   ;;  %s828_s12 = smov %s590_s13 }
 0x17e   : > { %p16_p6 = scmp.ge.s32.totalorder %s19_s17, 4   ;;  %s829_s13 = smov %s594_s14 }
 0x17f   : > { %s830_s14 = smov %s687_s26  ;;  %s831_s15 = smov %s602_s16 }
 0x180   : > { %s832_s16 = smov %s834_s20  ;;  %18 = sbr.rel (!%p16_p6) target bundleno = 6 (0x6), region = 83 }
 0x187   :  { %312 = vsyncpa [#allocation3], 1 }
 0x188   :  { %314 = vsyncpa [#allocation3 + $0x1], 1 }
 0x189   :  { %315 = vsyncpa [#allocation4], 1 }
 0x18a   :  { %317 = vsyncpa [#allocation4 + $0x1], 1 }

</bundles_post_ra>
